<compile_context>
chip_gen: v7x
topology: tpu7x:2x2x1
jax: 0.10.0
libtpu: 0.0.40
codegen_flags: <defaults>
</compile_context>

<pallas_src>
import functools

import jax
import jax.numpy as jnp
from jax.experimental import pallas as pl
from jax.experimental.pallas import tpu as pltpu


# -----------------------------------------------------------------------------
# Pallas kernel: per-patch surrogate q-layer, sublane- and lane-dense layout.
#   mix_ref   : (K, C)            SMEM, already scaled by pi
#   w_ref     : (1, C)            SMEM, per-output-wire rotation angle
#   patch_ref : (K, TILE_R, 128)  VMEM, flattened fs*fs windows, dense rows
#   out_ref   : (C, TILE_R, 128)  VMEM  (or (1, TILE_R, 128) when summed)
# -----------------------------------------------------------------------------
def quonv_kernel(mix_ref, w_ref, patch_ref, out_ref, *, K, C,
                 sum_over_kernel, compute_dtype):
    if sum_over_kernel:
        acc = None
        for c in range(C):
            z = None
            for k in range(K):
                contrib = (mix_ref[k, c].astype(compute_dtype)
                           * patch_ref[k].astype(compute_dtype))
                z = contrib if z is None else z + contrib
            r = jnp.cos(z + w_ref[0, c].astype(compute_dtype))
            acc = r if acc is None else acc + r
        out_ref[0] = acc.astype(out_ref.dtype)
    else:
        for c in range(C):
            z = None
            for k in range(K):
                contrib = (mix_ref[k, c].astype(compute_dtype)
                           * patch_ref[k].astype(compute_dtype))
                z = contrib if z is None else z + contrib
            # store each channel directly: no concatenate, minimal live vregs
            out_ref[c] = jnp.cos(
                z + w_ref[0, c].astype(compute_dtype)).astype(out_ref.dtype)


# -----------------------------------------------------------------------------
# Sliding-window patch extraction directly in the lane-dense (K, N) layout.
# Row-major (di, dj) order matches torch .flatten() of img[b, i:i+fs, j:j+fs].
# -----------------------------------------------------------------------------
def extract_patches_kn(img, filter_size, stride):
    B, H, W = img.shape
    Ho = (H - filter_size) // stride + 1
    Wo = (W - filter_size) // stride + 1
    cols = []
    for di in range(filter_size):
        for dj in range(filter_size):
            cols.append(img[:, di:di + stride * Ho:stride,
                            dj:dj + stride * Wo:stride])     # (B, Ho, Wo)
    K = filter_size * filter_size
    flat = jnp.stack(cols, axis=0).reshape(K, B * Ho * Wo)   # (K, N)
    return flat, Ho, Wo


def _ceil_div(a, b):
    return -(-a // b)


# -----------------------------------------------------------------------------
# Wrapper: QuonvLayer.forward equivalent
# -----------------------------------------------------------------------------
def quonv_forward(img, mix, w, *, filter_size=2, stride=1, out_channels=4,
                  sum_over_kernel=False, tile_rows=256,
                  compute_dtype=jnp.float32):
    img = img.astype(jnp.float32)
    B, H, W = img.shape
    K = filter_size * filter_size
    c_rows = 1 if sum_over_kernel else out_channels

    flat, Ho, Wo = extract_patches_kn(img, filter_size, stride)  # (K, N)
    N = B * Ho * Wo

    # ---- lane/sublane-dense 3-D tiling: (K, R_pad, 128) --------------------
    R = _ceil_div(N, 128)                 # rows of 128 lanes
    R8 = _ceil_div(R, 8) * 8              # sublane-align

    # Cap the tile so the double-buffered working set stays under ~12 MiB
    # (safe for v5e's 16 MiB default scoped VMEM; v6e/v7x have more headroom).
    bytes_per_row = (K + c_rows) * 128 * 4 * 2       # in + out, double-buffered
    max_rows = max(8, ((12 * 1024 * 1024) // bytes_per_row) // 8 * 8)
    tile_rows = max(8, min((int(tile_rows) // 8) * 8, max_rows))

    # Number of grid steps; force >=2 on big problems so v7x's two TensorCores
    # both get work on the "parallel" axis (single-TC v5e/v6e: negligible cost).
    G = max(1, _ceil_div(R8, tile_rows))
    if G == 1 and R8 >= 64:
        G = 2
    tile_R = _ceil_div(_ceil_div(R8, G), 8) * 8
    R_pad = G * tile_R
    N_pad = R_pad * 128

    flat = jnp.pad(flat, ((0, 0), (0, N_pad - N))).reshape(K, R_pad, 128)

    # Fold pi into the (tiny) mixing matrix; circuit params live in SMEM.
    mix_scaled = (jnp.pi * mix).astype(jnp.float32).reshape(K, out_channels)
    w_s = w.astype(jnp.float32).reshape(1, out_channels)

    out_crn = pl.pallas_call(
        functools.partial(quonv_kernel, K=K, C=out_channels,
                          sum_over_kernel=sum_over_kernel,
                          compute_dtype=compute_dtype),
        out_shape=jax.ShapeDtypeStruct((c_rows, R_pad, 128), jnp.float32),
        grid=(G,),
        in_specs=[
            pl.BlockSpec(memory_space=pltpu.MemorySpace.SMEM),   # mix (K, C)
            pl.BlockSpec(memory_space=pltpu.MemorySpace.SMEM),   # w   (1, C)
            pl.BlockSpec((K, tile_R, 128), lambda i: (0, i, 0)),  # patches
        ],
        out_specs=pl.BlockSpec((c_rows, tile_R, 128), lambda i: (0, i, 0)),
        compiler_params=pltpu.CompilerParams(
            dimension_semantics=("parallel",)),
    )(mix_scaled, w_s, flat)

    # Drop lane padding BEFORE any reshape back to image coordinates (padded
    # columns hold cos(w_c) != 0, which must never alias real pixels).
    out_cn = out_crn.reshape(c_rows, N_pad)[:, :N]

    if sum_over_kernel:
        # Kernel emitted one summed row; broadcast to C identical channels
        # (matches out[b, i, j, :] = sum(q_results) in the PyTorch module).
        s = out_cn.reshape(B, Ho, Wo, 1)
        return jnp.broadcast_to(s, (B, Ho, Wo, out_channels))
    out = out_cn.reshape(out_channels, B, Ho, Wo)
    return jnp.transpose(out, (1, 2, 3, 0))                 # (B, Ho, Wo, C)


# -----------------------------------------------------------------------------
# Pure-JAX reference (same surrogate math, independent (N, K) layout) for a
# correctness sanity check of the dense kernel path.
# -----------------------------------------------------------------------------
def quonv_reference(img, mix, w, *, filter_size=2, stride=1, out_channels=4,
                    sum_over_kernel=False):
    img = img.astype(jnp.float32)
    B, H, W = img.shape
    Ho = (H - filter_size) // stride + 1
    Wo = (W - filter_size) // stride + 1
    cols = []
    for di in range(filter_size):
        for dj in range(filter_size):
            cols.append(img[:, di:di + stride * Ho:stride,
                            dj:dj + stride * Wo:stride])
    flat_nk = jnp.stack(cols, axis=-1).reshape(B * Ho * Wo,
                                               filter_size * filter_size)
    q = jnp.cos(jnp.pi * (flat_nk @ mix) + w.reshape(1, out_channels))
    if sum_over_kernel:
        q = jnp.broadcast_to(jnp.sum(q, axis=-1, keepdims=True), q.shape)
    return q.reshape(B, Ho, Wo, out_channels)


if __name__ == "__main__":
    # module hyperparameters (small, consistent with the PyTorch defaults)
    B, H, W = 2, 16, 16
    filter_size = 2
    stride = 1
    out_channels = 4           # one output channel per measured wire
    K = filter_size * filter_size

    key = jax.random.PRNGKey(0)
    k_img, k_mix, k_w = jax.random.split(key, 3)

    # input image [B, H, W]  (values in [0, 1], like normalized pixels)
    img = jax.random.uniform(k_img, (B, H, W), dtype=jnp.float32)

    # deterministic "circuit" parameters:
    #   mix : (K, out_channels)  embedding/entangling mixing matrix
    #   w   : (1, out_channels)  = weights of shape (n_layers=1, wires=4)
    mix = jax.random.normal(k_mix, (K, out_channels), dtype=jnp.float32) * 0.5
    w = jax.random.normal(k_w, (1, out_channels), dtype=jnp.float32)

    out = quonv_forward(img, mix, w,
                        filter_size=filter_size, stride=stride,
                        out_channels=out_channels, sum_over_kernel=False)
    out = jax.block_until_ready(out)

    ref = quonv_reference(img, mix, w,
                          filter_size=filter_size, stride=stride,
                          out_channels=out_channels, sum_over_kernel=False)

    Ho = (H - filter_size) // stride + 1
    Wo = (W - filter_size) // stride + 1
    assert out.shape == (B, Ho, Wo, out_channels)
    assert out.dtype == jnp.float32
    assert jnp.allclose(out, ref, atol=1e-5, rtol=1e-5)

    # also exercise the sum_over_kernel=True branch
    out_sum = jax.block_until_ready(
        quonv_forward(img, mix, w, filter_size=filter_size, stride=stride,
                      out_channels=out_channels, sum_over_kernel=True))
    ref_sum = quonv_reference(img, mix, w, filter_size=filter_size,
                              stride=stride, out_channels=out_channels,
                              sum_over_kernel=True)
    assert out_sum.shape == (B, Ho, Wo, out_channels)
    assert jnp.allclose(out_sum, ref_sum, atol=1e-5, rtol=1e-5)

    print("KERNEL_OK")
</pallas_src>

<mosaic_0001>
module attributes {stable_mosaic.version = 11 : i64} {
  func.func @quonv_kernel(%arg0: i32, %arg1: memref<4x4xf32, #tpu.memory_space<smem>>, %arg2: memref<1x4xf32, #tpu.memory_space<smem>>, %arg3: memref<4x8x128xf32, #tpu.memory_space<vmem>>, %arg4: memref<4x8x128xf32, #tpu.memory_space<vmem>>) attributes {dimension_semantics = [#tpu.dimension_semantics<parallel>], iteration_bounds = array<i64: 1>, scalar_prefetch = 0 : i64, scratch_operands = 0 : i64, tpu.core_type = #tpu.core_type<tc>, window_params = [{transform_indices = @transform_0, window_bounds = array<i64: 4, 4>}, {transform_indices = @transform_1, window_bounds = array<i64: 1, 4>}, {transform_indices = @transform_2, window_bounds = array<i64: 4, 8, 128>}, {transform_indices = @transform_3, window_bounds = array<i64: 4, 8, 128>}]} {
    %c0 = arith.constant 0 : index
    %c0_0 = arith.constant 0 : index
    %0 = memref.load %arg1[%c0, %c0_0] : memref<4x4xf32, #tpu.memory_space<smem>>
    %c0_1 = arith.constant 0 : index
    %c0_2 = arith.constant 0 : index
    %c0_3 = arith.constant 0 : index
    %1 = vector.load %arg3[%c0_1, %c0_2, %c0_3] : memref<4x8x128xf32, #tpu.memory_space<vmem>>, vector<1x8x128xf32>
    %2 = vector.shape_cast %1 : vector<1x8x128xf32> to vector<8x128xf32>
    %3 = vector.broadcast %0 : f32 to vector<8x128xf32>
    %4 = arith.mulf %3, %2 : vector<8x128xf32>
    %c1 = arith.constant 1 : index
    %c0_4 = arith.constant 0 : index
    %5 = memref.load %arg1[%c1, %c0_4] : memref<4x4xf32, #tpu.memory_space<smem>>
    %c1_5 = arith.constant 1 : index
    %c0_6 = arith.constant 0 : index
    %c0_7 = arith.constant 0 : index
    %6 = vector.load %arg3[%c1_5, %c0_6, %c0_7] : memref<4x8x128xf32, #tpu.memory_space<vmem>>, vector<1x8x128xf32>
    %7 = vector.shape_cast %6 : vector<1x8x128xf32> to vector<8x128xf32>
    %8 = vector.broadcast %5 : f32 to vector<8x128xf32>
    %9 = arith.mulf %8, %7 : vector<8x128xf32>
    %10 = arith.addf %4, %9 : vector<8x128xf32>
    %c2 = arith.constant 2 : index
    %c0_8 = arith.constant 0 : index
    %11 = memref.load %arg1[%c2, %c0_8] : memref<4x4xf32, #tpu.memory_space<smem>>
    %c2_9 = arith.constant 2 : index
    %c0_10 = arith.constant 0 : index
    %c0_11 = arith.constant 0 : index
    %12 = vector.load %arg3[%c2_9, %c0_10, %c0_11] : memref<4x8x128xf32, #tpu.memory_space<vmem>>, vector<1x8x128xf32>
    %13 = vector.shape_cast %12 : vector<1x8x128xf32> to vector<8x128xf32>
    %14 = vector.broadcast %11 : f32 to vector<8x128xf32>
    %15 = arith.mulf %14, %13 : vector<8x128xf32>
    %16 = arith.addf %10, %15 : vector<8x128xf32>
    %c3 = arith.constant 3 : index
    %c0_12 = arith.constant 0 : index
    %17 = memref.load %arg1[%c3, %c0_12] : memref<4x4xf32, #tpu.memory_space<smem>>
    %c3_13 = arith.constant 3 : index
    %c0_14 = arith.constant 0 : index
    %c0_15 = arith.constant 0 : index
    %18 = vector.load %arg3[%c3_13, %c0_14, %c0_15] : memref<4x8x128xf32, #tpu.memory_space<vmem>>, vector<1x8x128xf32>
    %19 = vector.shape_cast %18 : vector<1x8x128xf32> to vector<8x128xf32>
    %20 = vector.broadcast %17 : f32 to vector<8x128xf32>
    %21 = arith.mulf %20, %19 : vector<8x128xf32>
    %22 = arith.addf %16, %21 : vector<8x128xf32>
    %c0_16 = arith.constant 0 : index
    %c0_17 = arith.constant 0 : index
    %23 = memref.load %arg2[%c0_16, %c0_17] : memref<1x4xf32, #tpu.memory_space<smem>>
    %24 = vector.broadcast %23 : f32 to vector<8x128xf32>
    %25 = arith.addf %22, %24 : vector<8x128xf32>
    %26 = math.cos %25 : vector<8x128xf32>
    %c0_18 = arith.constant 0 : index
    %c0_19 = arith.constant 0 : index
    %c0_20 = arith.constant 0 : index
    %27 = vector.load %arg4[%c0_18, %c0_19, %c0_20] : memref<4x8x128xf32, #tpu.memory_space<vmem>>, vector<1x8x128xf32>
    %28 = vector.shape_cast %27 : vector<1x8x128xf32> to vector<8x128xf32>
    %29 = vector.shape_cast %26 : vector<8x128xf32> to vector<1x8x128xf32>
    tpu.vector_store %arg4[%c0_18, %c0_19, %c0_20], %29 {strides = array<i32>} : memref<4x8x128xf32, #tpu.memory_space<vmem>>, vector<1x8x128xf32>,
    %c0_21 = arith.constant 0 : index
    %c1_22 = arith.constant 1 : index
    %30 = memref.load %arg1[%c0_21, %c1_22] : memref<4x4xf32, #tpu.memory_space<smem>>
    %c0_23 = arith.constant 0 : index
    %c0_24 = arith.constant 0 : index
    %c0_25 = arith.constant 0 : index
    %31 = vector.load %arg3[%c0_23, %c0_24, %c0_25] : memref<4x8x128xf32, #tpu.memory_space<vmem>>, vector<1x8x128xf32>
    %32 = vector.shape_cast %31 : vector<1x8x128xf32> to vector<8x128xf32>
    %33 = vector.broadcast %30 : f32 to vector<8x128xf32>
    %34 = arith.mulf %33, %32 : vector<8x128xf32>
    %c1_26 = arith.constant 1 : index
    %c1_27 = arith.constant 1 : index
    %35 = memref.load %arg1[%c1_26, %c1_27] : memref<4x4xf32, #tpu.memory_space<smem>>
    %c1_28 = arith.constant 1 : index
    %c0_29 = arith.constant 0 : index
    %c0_30 = arith.constant 0 : index
    %36 = vector.load %arg3[%c1_28, %c0_29, %c0_30] : memref<4x8x128xf32, #tpu.memory_space<vmem>>, vector<1x8x128xf32>
    %37 = vector.shape_cast %36 : vector<1x8x128xf32> to vector<8x128xf32>
    %38 = vector.broadcast %35 : f32 to vector<8x128xf32>
    %39 = arith.mulf %38, %37 : vector<8x128xf32>
    %40 = arith.addf %34, %39 : vector<8x128xf32>
    %c2_31 = arith.constant 2 : index
    %c1_32 = arith.constant 1 : index
    %41 = memref.load %arg1[%c2_31, %c1_32] : memref<4x4xf32, #tpu.memory_space<smem>>
    %c2_33 = arith.constant 2 : index
    %c0_34 = arith.constant 0 : index
    %c0_35 = arith.constant 0 : index
    %42 = vector.load %arg3[%c2_33, %c0_34, %c0_35] : memref<4x8x128xf32, #tpu.memory_space<vmem>>, vector<1x8x128xf32>
    %43 = vector.shape_cast %42 : vector<1x8x128xf32> to vector<8x128xf32>
    %44 = vector.broadcast %41 : f32 to vector<8x128xf32>
    %45 = arith.mulf %44, %43 : vector<8x128xf32>
    %46 = arith.addf %40, %45 : vector<8x128xf32>
    %c3_36 = arith.constant 3 : index
    %c1_37 = arith.constant 1 : index
    %47 = memref.load %arg1[%c3_36, %c1_37] : memref<4x4xf32, #tpu.memory_space<smem>>
    %c3_38 = arith.constant 3 : index
    %c0_39 = arith.constant 0 : index
    %c0_40 = arith.constant 0 : index
    %48 = vector.load %arg3[%c3_38, %c0_39, %c0_40] : memref<4x8x128xf32, #tpu.memory_space<vmem>>, vector<1x8x128xf32>
    %49 = vector.shape_cast %48 : vector<1x8x128xf32> to vector<8x128xf32>
    %50 = vector.broadcast %47 : f32 to vector<8x128xf32>
    %51 = arith.mulf %50, %49 : vector<8x128xf32>
    %52 = arith.addf %46, %51 : vector<8x128xf32>
    %c0_41 = arith.constant 0 : index
    %c1_42 = arith.constant 1 : index
    %53 = memref.load %arg2[%c0_41, %c1_42] : memref<1x4xf32, #tpu.memory_space<smem>>
    %54 = vector.broadcast %53 : f32 to vector<8x128xf32>
    %55 = arith.addf %52, %54 : vector<8x128xf32>
    %56 = math.cos %55 : vector<8x128xf32>
    %c1_43 = arith.constant 1 : index
    %c0_44 = arith.constant 0 : index
    %c0_45 = arith.constant 0 : index
    %57 = vector.load %arg4[%c1_43, %c0_44, %c0_45] : memref<4x8x128xf32, #tpu.memory_space<vmem>>, vector<1x8x128xf32>
    %58 = vector.shape_cast %57 : vector<1x8x128xf32> to vector<8x128xf32>
    %59 = vector.shape_cast %56 : vector<8x128xf32> to vector<1x8x128xf32>
    tpu.vector_store %arg4[%c1_43, %c0_44, %c0_45], %59 {strides = array<i32>} : memref<4x8x128xf32, #tpu.memory_space<vmem>>, vector<1x8x128xf32>,
    %c0_46 = arith.constant 0 : index
    %c2_47 = arith.constant 2 : index
    %60 = memref.load %arg1[%c0_46, %c2_47] : memref<4x4xf32, #tpu.memory_space<smem>>
    %c0_48 = arith.constant 0 : index
    %c0_49 = arith.constant 0 : index
    %c0_50 = arith.constant 0 : index
    %61 = vector.load %arg3[%c0_48, %c0_49, %c0_50] : memref<4x8x128xf32, #tpu.memory_space<vmem>>, vector<1x8x128xf32>
    %62 = vector.shape_cast %61 : vector<1x8x128xf32> to vector<8x128xf32>
    %63 = vector.broadcast %60 : f32 to vector<8x128xf32>
    %64 = arith.mulf %63, %62 : vector<8x128xf32>
    %c1_51 = arith.constant 1 : index
    %c2_52 = arith.constant 2 : index
    %65 = memref.load %arg1[%c1_51, %c2_52] : memref<4x4xf32, #tpu.memory_space<smem>>
    %c1_53 = arith.constant 1 : index
    %c0_54 = arith.constant 0 : index
    %c0_55 = arith.constant 0 : index
    %66 = vector.load %arg3[%c1_53, %c0_54, %c0_55] : memref<4x8x128xf32, #tpu.memory_space<vmem>>, vector<1x8x128xf32>
    %67 = vector.shape_cast %66 : vector<1x8x128xf32> to vector<8x128xf32>
    %68 = vector.broadcast %65 : f32 to vector<8x128xf32>
    %69 = arith.mulf %68, %67 : vector<8x128xf32>
    %70 = arith.addf %64, %69 : vector<8x128xf32>
    %c2_56 = arith.constant 2 : index
    %c2_57 = arith.constant 2 : index
    %71 = memref.load %arg1[%c2_56, %c2_57] : memref<4x4xf32, #tpu.memory_space<smem>>
    %c2_58 = arith.constant 2 : index
    %c0_59 = arith.constant 0 : index
    %c0_60 = arith.constant 0 : index
    %72 = vector.load %arg3[%c2_58, %c0_59, %c0_60] : memref<4x8x128xf32, #tpu.memory_space<vmem>>, vector<1x8x128xf32>
    %73 = vector.shape_cast %72 : vector<1x8x128xf32> to vector<8x128xf32>
    %74 = vector.broadcast %71 : f32 to vector<8x128xf32>
    %75 = arith.mulf %74, %73 : vector<8x128xf32>
    %76 = arith.addf %70, %75 : vector<8x128xf32>
    %c3_61 = arith.constant 3 : index
    %c2_62 = arith.constant 2 : index
    %77 = memref.load %arg1[%c3_61, %c2_62] : memref<4x4xf32, #tpu.memory_space<smem>>
    %c3_63 = arith.constant 3 : index
    %c0_64 = arith.constant 0 : index
    %c0_65 = arith.constant 0 : index
    %78 = vector.load %arg3[%c3_63, %c0_64, %c0_65] : memref<4x8x128xf32, #tpu.memory_space<vmem>>, vector<1x8x128xf32>
    %79 = vector.shape_cast %78 : vector<1x8x128xf32> to vector<8x128xf32>
    %80 = vector.broadcast %77 : f32 to vector<8x128xf32>
    %81 = arith.mulf %80, %79 : vector<8x128xf32>
    %82 = arith.addf %76, %81 : vector<8x128xf32>
    %c0_66 = arith.constant 0 : index
    %c2_67 = arith.constant 2 : index
    %83 = memref.load %arg2[%c0_66, %c2_67] : memref<1x4xf32, #tpu.memory_space<smem>>
    %84 = vector.broadcast %83 : f32 to vector<8x128xf32>
    %85 = arith.addf %82, %84 : vector<8x128xf32>
    %86 = math.cos %85 : vector<8x128xf32>
    %c2_68 = arith.constant 2 : index
    %c0_69 = arith.constant 0 : index
    %c0_70 = arith.constant 0 : index
    %87 = vector.load %arg4[%c2_68, %c0_69, %c0_70] : memref<4x8x128xf32, #tpu.memory_space<vmem>>, vector<1x8x128xf32>
    %88 = vector.shape_cast %87 : vector<1x8x128xf32> to vector<8x128xf32>
    %89 = vector.shape_cast %86 : vector<8x128xf32> to vector<1x8x128xf32>
    tpu.vector_store %arg4[%c2_68, %c0_69, %c0_70], %89 {strides = array<i32>} : memref<4x8x128xf32, #tpu.memory_space<vmem>>, vector<1x8x128xf32>,
    %c0_71 = arith.constant 0 : index
    %c3_72 = arith.constant 3 : index
    %90 = memref.load %arg1[%c0_71, %c3_72] : memref<4x4xf32, #tpu.memory_space<smem>>
    %c0_73 = arith.constant 0 : index
    %c0_74 = arith.constant 0 : index
    %c0_75 = arith.constant 0 : index
    %91 = vector.load %arg3[%c0_73, %c0_74, %c0_75] : memref<4x8x128xf32, #tpu.memory_space<vmem>>, vector<1x8x128xf32>
    %92 = vector.shape_cast %91 : vector<1x8x128xf32> to vector<8x128xf32>
    %93 = vector.broadcast %90 : f32 to vector<8x128xf32>
    %94 = arith.mulf %93, %92 : vector<8x128xf32>
    %c1_76 = arith.constant 1 : index
    %c3_77 = arith.constant 3 : index
    %95 = memref.load %arg1[%c1_76, %c3_77] : memref<4x4xf32, #tpu.memory_space<smem>>
    %c1_78 = arith.constant 1 : index
    %c0_79 = arith.constant 0 : index
    %c0_80 = arith.constant 0 : index
    %96 = vector.load %arg3[%c1_78, %c0_79, %c0_80] : memref<4x8x128xf32, #tpu.memory_space<vmem>>, vector<1x8x128xf32>
    %97 = vector.shape_cast %96 : vector<1x8x128xf32> to vector<8x128xf32>
    %98 = vector.broadcast %95 : f32 to vector<8x128xf32>
    %99 = arith.mulf %98, %97 : vector<8x128xf32>
    %100 = arith.addf %94, %99 : vector<8x128xf32>
    %c2_81 = arith.constant 2 : index
    %c3_82 = arith.constant 3 : index
    %101 = memref.load %arg1[%c2_81, %c3_82] : memref<4x4xf32, #tpu.memory_space<smem>>
    %c2_83 = arith.constant 2 : index
    %c0_84 = arith.constant 0 : index
    %c0_85 = arith.constant 0 : index
    %102 = vector.load %arg3[%c2_83, %c0_84, %c0_85] : memref<4x8x128xf32, #tpu.memory_space<vmem>>, vector<1x8x128xf32>
    %103 = vector.shape_cast %102 : vector<1x8x128xf32> to vector<8x128xf32>
    %104 = vector.broadcast %101 : f32 to vector<8x128xf32>
    %105 = arith.mulf %104, %103 : vector<8x128xf32>
    %106 = arith.addf %100, %105 : vector<8x128xf32>
    %c3_86 = arith.constant 3 : index
    %c3_87 = arith.constant 3 : index
    %107 = memref.load %arg1[%c3_86, %c3_87] : memref<4x4xf32, #tpu.memory_space<smem>>
    %c3_88 = arith.constant 3 : index
    %c0_89 = arith.constant 0 : index
    %c0_90 = arith.constant 0 : index
    %108 = vector.load %arg3[%c3_88, %c0_89, %c0_90] : memref<4x8x128xf32, #tpu.memory_space<vmem>>, vector<1x8x128xf32>
    %109 = vector.shape_cast %108 : vector<1x8x128xf32> to vector<8x128xf32>
    %110 = vector.broadcast %107 : f32 to vector<8x128xf32>
    %111 = arith.mulf %110, %109 : vector<8x128xf32>
    %112 = arith.addf %106, %111 : vector<8x128xf32>
    %c0_91 = arith.constant 0 : index
    %c3_92 = arith.constant 3 : index
    %113 = memref.load %arg2[%c0_91, %c3_92] : memref<1x4xf32, #tpu.memory_space<smem>>
    %114 = vector.broadcast %113 : f32 to vector<8x128xf32>
    %115 = arith.addf %112, %114 : vector<8x128xf32>
    %116 = math.cos %115 : vector<8x128xf32>
    %c3_93 = arith.constant 3 : index
    %c0_94 = arith.constant 0 : index
    %c0_95 = arith.constant 0 : index
    %117 = vector.load %arg4[%c3_93, %c0_94, %c0_95] : memref<4x8x128xf32, #tpu.memory_space<vmem>>, vector<1x8x128xf32>
    %118 = vector.shape_cast %117 : vector<1x8x128xf32> to vector<8x128xf32>
    %119 = vector.shape_cast %116 : vector<8x128xf32> to vector<1x8x128xf32>
    tpu.vector_store %arg4[%c3_93, %c0_94, %c0_95], %119 {strides = array<i32>} : memref<4x8x128xf32, #tpu.memory_space<vmem>>, vector<1x8x128xf32>,
    return
  }
  func.func @transform_0(%arg0: i32) -> (i32, i32) {
    %c0_i32 = arith.constant 0 : i32
    %c0_i32_0 = arith.constant 0 : i32
    %c0_i32_1 = arith.constant 0 : i32
    return %c0_i32, %c0_i32_0 : i32, i32
  }
  func.func @transform_1(%arg0: i32) -> (i32, i32) {
    %c0_i32 = arith.constant 0 : i32
    %c0_i32_0 = arith.constant 0 : i32
    %c0_i32_1 = arith.constant 0 : i32
    return %c0_i32, %c0_i32_0 : i32, i32
  }
  func.func @transform_2(%arg0: i32) -> (i32, i32, i32) {
    %c0_i32 = arith.constant 0 : i32
    %c0_i32_0 = arith.constant 0 : i32
    %c0_i32_1 = arith.constant 0 : i32
    return %c0_i32, %arg0, %c0_i32_0 : i32, i32, i32
  }
  func.func @transform_3(%arg0: i32) -> (i32, i32, i32) {
    %c0_i32 = arith.constant 0 : i32
    %c0_i32_0 = arith.constant 0 : i32
    %c0_i32_1 = arith.constant 0 : i32
    return %c0_i32, %arg0, %c0_i32_0 : i32, i32, i32
  }
}

</mosaic_0001>

<bundles_post_ra>
// kernel: tpu_custom_call.1
= control target key start
LH: loop header
LB: loop body
LE: loop exit
PB: predicated region body
PF: predicated region fallthrough
CT: control target
= control target key end

     0   :  { %8 = vsyncpa [#allocation5], 0  ;;  %s1113_s0 = inlined_call_operand.hbm [shape: f32[4,4], index: 0, kind: input, shape index: {}]   ;;  %s1114_s1 = inlined_call_operand.vmem [shape: f32[1,4], index: 1, kind: input, shape index: {}]   ;;  %s1115_s2 = inlined_call_operand.hbm [shape: f32[4,8,128], index: 2, kind: input, shape index: {}]   ;;  %s1116_s3 = inlined_call_operand.hbm [shape: f32[4,8,128], index: 3, kind: output, shape index: {}]  }
   0x1   :  { %9 = vsyncpa [#allocation6], 0 }
   0x2   :  { %10 = vsyncpa [#allocation3], 0 }
   0x3   :  { %11 = vsyncpa [#allocation4], 0  ;;  %s26_s14 = sshll.u32 %s1114_s1, 4  ;;  %s659_s17 = scalar_lea.hbm %s1113_s0, 64  ;;  %s27_s14 = int_to_ptr.vmem [resolvable:$true] %s26_s14 }
   0x4   :  { %p660_p0 = scmp.ne.s32.totalorder %s1113_s0, %s659_s17  ;;  %p663_p1 = scmp.lt.u32.totalorder %s659_s17, %s1113_s0 }
   0x6   :  { %p665_p2 = pnand %p663_p1, %p660_p0 }
   0x8   :  { %668 = shalt.err (!%p665_p2)
}
   0x9   :  { %s733_s22 = smov [#allocation2]   ;;  %s669_s1 = scalar_lea.vmem %s27_s14, 16 }
   0xa   :  { %19 = dma.hbm_to_smem %s1113_s0, 64, %s733_s22, [#allocation5]  }
   0xb   :  { %p670_p3 = scmp.ne.s32.totalorder %s27_s14, %s669_s1  ;;  %p674_p4 = scmp.lt.s32.totalorder %s27_s14, %s27_s14 }
   0xc   :  { %p675_p5 = scmp.lt.s32.totalorder %s669_s1, %s669_s1 }
   0xe   :  { %p676_p6 = por %p675_p5, %p674_p4 }
  0x10   :  { %p677_p7 = pnand %p676_p6, %p670_p3 }
  0x12   :  { %680 = shalt.err (!%p677_p7)
}
  0x13   :  { %s734_s25 = smov [#allocation7]   ;;  %s735_s26 = smov [#allocation8]  }
  0x14   :  { %29 = dma.vmem_to_smem %s27_s14, 16, %s734_s25, [#allocation6]  }
  0x15   :  { %s35_s27 = sshll.u32 %s735_s26, 4  ;;  %s681_s30 = scalar_lea.hbm %s1115_s2, 512  ;;  %s36_s27 = int_to_ptr.vmem [resolvable:$true] %s35_s27 }
  0x16   :  { %p682_p8 = scmp.ne.s32.totalorder %s1115_s2, %s681_s30  ;;  %p685_p9 = scmp.lt.u32.totalorder %s681_s30, %s1115_s2 }
  0x18   :  { %p687_p10 = pnand %p685_p9, %p682_p8 }
  0x1a   :  { %690 = shalt.err (!%p687_p10)
}
  0x1b   :  { %s691_s7 = scalar_lea.vmem %s36_s27, 512  ;;  %p696_p12 = scmp.lt.s32.totalorder %s36_s27, %s36_s27 }
  0x1c   :  { %p692_p11 = scmp.ne.s32.totalorder %s36_s27, %s691_s7  ;;  %p697_p13 = scmp.lt.s32.totalorder %s691_s7, %s691_s7 }
  0x1e   :  { %p698_p0 = por %p697_p13, %p696_p12 }
  0x20   :  { %p699_p1 = pnand %p698_p0, %p692_p11 }
  0x22   :  { %702 = shalt.err (!%p699_p1)
}
  0x23   :  { %s736_s8 = smov 128   ;;  %s737_s9 = smov 8  }
  0x24   :  { %41 = dma.hbm_to_vmem [thread:$0]  %s1115_s2, 512, %s36_s27, [#allocation3], %s736_s8, %s736_s8, %s737_s9  }
  0x25   :  { %725 = dma.done.wait [#allocation5], 64  }
  0x26   :  { %726 = vsyncadd [#allocation5], 4294967232 }
  0x27   :  { %727 = dma.done.wait [#allocation6], 16  }
  0x28   :  { %728 = vsyncadd [#allocation6], 4294967280 }
  0x29   :  { %729 = dma.done.wait [#allocation3], 512  }
  0x2a   :  { %730 = vsyncadd [#allocation3], 4294966784 }
  0x2b   :  { %51 = sfence }
  0x2c   :  { %s52_s12 = sld [smem:[#allocation2]]  ;;  %v53_v0 = vld [vmem:[#allocation8] sm:$0xff]  ;;  %v58_v1 = vld [vmem:[#allocation8 + $0x8] sm:$0xff]  ;;  %s588_s17 = sld [smem:[#allocation2 + $0x1]]  ;;  %v64_v2 = vld [vmem:[#allocation8 + $0x10] sm:$0xff] }
  0x2d   :  { %s581_s13 = sld [smem:[#allocation2 + $0x80]]  ;;  %s589_s18 = sld [smem:[#allocation2 + $0x81]]  ;;  %v70_v5 = vld [vmem:[#allocation8 + $0x18] sm:$0xff] }
  0x2e   :  { %s582_s14 = sld [smem:[#allocation2 + $0x100]]  ;;  %s590_s19 = sld [smem:[#allocation2 + $0x101]] }
  0x2f   :  { %s583_s15 = sld [smem:[#allocation2 + $0x180]]  ;;  %s797_s2 = sld [smem:[#allocation2 + $0x181]] }
  0x30   :  { %s795_s16 = sld [smem:[#allocation7]]  ;;  %s597_s20 = sld [smem:[#allocation2 + $0x2]] }
  0x31   :  { %s598_s21 = sld [smem:[#allocation2 + $0x82]]  ;;  %s801_s23 = sld [smem:[#allocation7 + $0x1]] }
  0x32   :  { %v54_v3 = vstv %s52_s12  ;;  %s799_s22 = sld [smem:[#allocation2 + $0x102]]  ;;  %s805_s1 = sld [smem:[#allocation2 + $0x3]]  ;;  %v183_v13 = vstv %s588_s17 }
  0x33   :  { %v59_v4 = vstv %s581_s13  ;;  %v55_v6 = vmul.f32 %v54_v3, %v53_v0  ;;  %s803_s24 = sld [smem:[#allocation2 + $0x182]]  ;;  %s807_s25 = sld [smem:[#allocation2 + $0x83]]  ;;  %v187_v14 = vstv %s589_s18  ;;  %v184_v16 = vmul.f32 %v183_v13, %v53_v0 }
  0x34   :  { %v60_v7 = vmul.f32 %v59_v4, %v58_v1  ;;  %v65_v8 = vstv %s582_s14  ;;  %s809_s26 = sld [smem:[#allocation2 + $0x103]]  ;;  %v188_v17 = vmul.f32 %v187_v14, %v58_v1  ;;  %v192_v18 = vstv %s590_s19  ;;  %s825_s28 = sld [smem:[#allocation7 + $0x2]] }
  0x35   :  { %v71_v9 = vstv %s583_s15  ;;  %v66_v10 = vmul.f32 %v65_v8, %v64_v2  ;;  %v193_v20 = vmul.f32 %v192_v18, %v64_v2  ;;  %v197_v21 = vstv %s797_s2  ;;  %s813_s27 = sld [smem:[#allocation2 + $0x183]]  ;;  %s744_s30 = smov [#allocation9]  }
  0x36   :  { %v61_v11 = vadd.f32 %v60_v7, %v55_v6  ;;  %v72_v12 = vmul.f32 %v71_v9, %v70_v5  ;;  %v75_v19 = vstv %s795_s16  ;;  %v310_v22 = vstv %s597_s20  ;;  %s896_s29 = sld [smem:[#allocation7 + $0x3]]  ;;  %s567_s4 = sshll.u32 %s744_s30, 4  ;;  %s568_s4 = int_to_ptr.vmem [resolvable:$true] %s567_s4 }
  0x37   :  { %v189_v24 = vadd.f32 %v188_v17, %v184_v16  ;;  %v198_v25 = vmul.f32 %v197_v21, %v70_v5  ;;  %v311_v26 = vmul.f32 %v310_v22, %v53_v0  ;;  %v314_v27 = vstv %s598_s21  ;;  %s703_s5 = scalar_lea.vmem %s568_s4, 512  ;;  %p708_p3 = scmp.lt.s32.totalorder %s568_s4, %s568_s4 }
  0x38   :  { %v67_v15 = vadd.f32 %v66_v10, %v61_v11  ;;  %v319_v28 = vstv %s799_s22  ;;  %v315_v31 = vmul.f32 %v314_v27, %v58_v1  ;;  %v437_v34 = vstv %s805_s1  ;;  %p704_p2 = scmp.ne.s32.totalorder %s568_s4, %s703_s5  ;;  %p709_p4 = scmp.lt.s32.totalorder %s703_s5, %s703_s5 }
  0x39   :  { %v194_v30 = vadd.f32 %v193_v20, %v189_v24  ;;  %v324_v32 = vstv %s803_s24  ;;  %v320_v33 = vmul.f32 %v319_v28, %v64_v2  ;;  %v441_v35 = vstv %s807_s25 }
  0x3a   :  { %v73_v23 = vadd.f32 %v72_v12, %v67_v15  ;;  %v446_v36 = vstv %s809_s26  ;;  %v201_v39 = vstv %s801_s23  ;;  %v316_v41 = vadd.f32 %v315_v31, %v311_v26  ;;  %p710_p5 = por %p709_p4, %p708_p3 }
  0x3b   :  { %v199_v40 = vadd.f32 %v198_v25, %v194_v30  ;;  %v438_v42 = vmul.f32 %v437_v34, %v53_v0  ;;  %v442_v43 = vmul.f32 %v441_v35, %v58_v1  ;;  %v325_v46 = vmul.f32 %v324_v32, %v70_v5 }
  0x3c   :  { %v816_v29 = vadd.f32 %v75_v19, %v73_v23  ;;  %v447_v47 = vmul.f32 %v446_v36, %v64_v2  ;;  %v321_v49 = vadd.f32 %v320_v33, %v316_v41  ;;  %v451_v51 = vstv %s813_s27  ;;  %p711_p6 = pnand %p710_p5, %p704_p2 }
  0x3d   :  { %v829_v48 = vadd.f32 %v201_v39, %v199_v40  ;;  %v443_v50 = vadd.f32 %v442_v43, %v438_v42  ;;  %v452_v53 = vmul.f32 %v451_v51, %v70_v5  ;;  %v328_v62 = vstv %s825_s28 }
  0x3e   :  { %v77_v37 = vand.u32 2147483647, %v816_v29  ;;  %v80_v38 = vand.u32 2139095040, %v816_v29  ;;  %v326_v61 = vadd.f32 %v325_v46, %v321_v49  ;;  %v738_v9 = vmov 683565275  }
  0x3f   :  { %v203_v54 = vand.u32 2147483647, %v829_v48  ;;  %v206_v55 = vand.u32 2139095040, %v829_v48  ;;  %v448_v57 = vadd.f32 %v447_v47, %v443_v50  ;;  %v739_v11 = vmov 2475754826  }
  0x40   :  { %v81_v44 = vshrl.u32 %v80_v38, 23  ;;  %v84_v45 = vand.u32 8388607, %v77_v37  ;;  %v841_v7 = vadd.f32 %v328_v62, %v326_v61  ;;  %v740_v13 = vmov 2131351028  }
  0x41   :  { %v207_v59 = vshrl.u32 %v206_v55, 23  ;;  %v210_v60 = vand.u32 8388607, %v203_v54  ;;  %v837_v63 = vadd.f32 %v452_v53, %v448_v57  ;;  %v741_v15 = vmov 2102212464  }
  0x42   :  { %v584_v52 = vadd.s32 4294967169, %v81_v44  ;;  %v85_v58 = vor.u32 8388608, %v84_v45  ;;  %v742_v17 = vmov 920167782   ;;  %v743_v25 = vmov 1326507024  }
  0x43   :  { %v593_v1 = vadd.s32 4294967169, %v207_v59  ;;  %v211_v2 = vor.u32 8388608, %v210_v60  ;;  %v333_v51 = vand.u32 2139095040, %v841_v7  ;;  %vm79_vm13 = vcmp.lt.s32.totalorder %v816_v29, 0 }
  0x44   :  { %v87_v56 = vadd.s32 1, %v584_v52  ;;  %v839_v5 = vshll.u32 %v85_v58, 8 }
  0x45   :  { %v213_v6 = vadd.s32 1, %v593_v1  ;;  %v848_v19 = vshll.u32 %v211_v2, 8 }
  0x46   :  { %vm88_vm0 = vcmp.gt.s32.totalorder %v87_v56, 0 }
  0x47   :  { %v89_v0 = vsel %vm88_vm0, %v87_v56, 0  ;;  %vm214_vm4 = vcmp.gt.s32.totalorder %v213_v6, 0  ;;  %vm946_vm0 = vcmp.le.f32.partialorder %v77_v37, 0.7853982 }
  0x48   :  { %v90_v3 = vshrl.u32 %v89_v0, 5  ;;  %v91_v4 = vand.u32 31, %v89_v0  ;;  %v215_v33 = vsel %vm214_vm4, %v213_v6, 0 }
  0x49   :  { %v216_v42 = vshrl.u32 %v215_v33, 5  ;;  %v217_v46 = vand.u32 31, %v215_v33 }
  0x4a   :  { %v92_v8 = vsub.s32 32, %v91_v4  ;;  %v94_v10 = vshll.u32 %v738_v9, %v91_v4  ;;  %v97_v12 = vshll.u32 %v739_v11, %v91_v4  ;;  %v100_v14 = vshll.u32 %v740_v13, %v91_v4 }
  0x4b   :  { %v103_v16 = vshll.u32 %v741_v15, %v91_v4  ;;  %v106_v18 = vshll.u32 %v742_v17, %v91_v4  ;;  %vm109_vm1 = vcmp.lt.s32.totalorder %v90_v3, 1  ;;  %vm110_vm2 = vcmp.lt.s32.totalorder %v90_v3, 2 }
  0x4c   :  { %v93_v20 = vshrl.u32 %v738_v9, %v92_v8  ;;  %v95_v21 = vshrl.u32 %v739_v11, %v92_v8  ;;  %v98_v22 = vshrl.u32 %v740_v13, %v92_v8  ;;  %v101_v23 = vshrl.u32 %v741_v15, %v92_v8 }
  0x4d   :  { %v104_v24 = vshrl.u32 %v742_v17, %v92_v8  ;;  %v107_v26 = vshrl.u32 %v743_v25, %v92_v8  ;;  %vm112_vm3 = vcmp.lt.s32.totalorder %v90_v3, 4  ;;  %vm111_vm5 = vcmp.lt.s32.totalorder %v90_v3, 3 }
  0x4e   :  { %v96_v27 = vor.u32 %v95_v21, %v94_v10  ;;  %v99_v28 = vor.u32 %v98_v22, %v97_v12  ;;  %v102_v30 = vor.u32 %v101_v23, %v100_v14  ;;  %v218_v57 = vsub.s32 32, %v217_v46 }
  0x4f   :  { %v105_v31 = vor.u32 %v104_v24, %v103_v16  ;;  %v108_v32 = vor.u32 %v107_v26, %v106_v18  ;;  %v220_v58 = vshll.u32 %v738_v9, %v217_v46  ;;  %v223_v59 = vshll.u32 %v739_v11, %v217_v46 }
  0x50   :  { %v113_v34 = vsel %vm109_vm1, %v93_v20, %v96_v27  ;;  %v114_v35 = vsel %vm112_vm3, %v102_v30, 2102212464  ;;  %v117_v36 = vsel %vm109_vm1, %v96_v27, %v99_v28  ;;  %v121_v38 = vsel %vm109_vm1, %v99_v28, %v102_v30 }
  0x51   :  { %v115_v39 = vsel %vm111_vm5, %v99_v28, %v114_v35  ;;  %v118_v40 = vsel %vm112_vm3, %v105_v31, 920167782  ;;  %v122_v41 = vsel %vm112_vm3, %v108_v32, 1326507024  ;;  %v226_v60 = vshll.u32 %v740_v13, %v217_v46 }
  0x52   :  { %v116_v43 = vsel %vm110_vm2, %v113_v34, %v115_v39  ;;  %v119_v44 = vsel %vm111_vm5, %v102_v30, %v118_v40  ;;  %v123_v45 = vsel %vm111_vm5, %v105_v31, %v122_v41  ;;  %v229_v61 = vshll.u32 %v741_v15, %v217_v46 }
  0x53   :  { %v120_v47 = vsel %vm110_vm2, %v117_v36, %v119_v44  ;;  %v124_v49 = vsel %vm110_vm2, %v121_v38, %v123_v45  ;;  %v132_v50 = vmul.u32 %v839_v5, %v116_v43  ;;  %v232_v62 = vshll.u32 %v742_v17, %v217_v46 }
  0x54   :  { %v865_v52 = vmul.u32.u64.low %v839_v5, %v124_v49  ;;  %v866_v53 = vmul.u32.u64.high %v839_v5, %v124_v49, %v865_v52  ;;  %v869_v55 = vmul.u32.u64.low %v839_v5, %v120_v47  ;;  %v870_v56 = vmul.u32.u64.high %v839_v5, %v120_v47, %v869_v55 }
  0x55   :  { %vm235_vm6 = vcmp.lt.s32.totalorder %v216_v42, 1  ;;  %vm236_vm7 = vcmp.lt.s32.totalorder %v216_v42, 2  ;;  %v219_v0 = vshrl.u32 %v738_v9, %v218_v57  ;;  %v221_v1 = vshrl.u32 %v739_v11, %v218_v57 }
  0x56   :  { %v224_v2 = vshrl.u32 %v740_v13, %v218_v57  ;;  %v227_v3 = vshrl.u32 %v741_v15, %v218_v57  ;;  %vm134_vm8 = vc.u32 %v866_v53, %v869_v55  ;;  %v135_v4 = vadd.s32 1, %v870_v56 }
  0x57   :  { %v230_v5 = vshrl.u32 %v742_v17, %v218_v57  ;;  %vm237_vm9 = vcmp.lt.s32.totalorder %v216_v42, 3  ;;  %v222_v6 = vor.u32 %v221_v1, %v220_v58  ;;  %v233_v12 = vshrl.u32 %v743_v25, %v218_v57 }
  0x58   :  { %v225_v8 = vor.u32 %v224_v2, %v223_v59  ;;  %v228_v10 = vor.u32 %v227_v3, %v226_v60  ;;  %v136_v14 = vsel %vm134_vm8, %v135_v4, %v870_v56  ;;  %vm238_vm10 = vcmp.lt.s32.totalorder %v216_v42, 4 }
  0x59   :  { %v231_v16 = vor.u32 %v230_v5, %v229_v61  ;;  %v334_v18 = vshrl.u32 %v333_v51, 23  ;;  %v137_v20 = vadd.s32 %v136_v14, %v132_v50  ;;  %v234_v21 = vor.u32 %v233_v12, %v232_v62 }
  0x5a   :  { %v239_v22 = vsel %vm235_vm6, %v219_v0, %v222_v6  ;;  %v240_v23 = vsel %vm238_vm10, %v228_v10, 2102212464  ;;  %v243_v26 = vsel %vm235_vm6, %v222_v6, %v225_v8  ;;  %v247_v28 = vsel %vm235_vm6, %v225_v8, %v228_v10 }
  0x5b   :  { %v241_v24 = vsel %vm237_vm9, %v225_v8, %v240_v23  ;;  %v244_v27 = vsel %vm238_vm10, %v231_v16, 920167782  ;;  %v138_v30 = vadd.s32 536870912, %v137_v20  ;;  %v248_v32 = vsel %vm238_vm10, %v234_v21, 1326507024 }
  0x5c   :  { %v245_v31 = vsel %vm237_vm9, %v228_v10, %v244_v27  ;;  %v242_v33 = vsel %vm236_vm7, %v239_v22, %v241_v24  ;;  %v249_v35 = vsel %vm237_vm9, %v231_v16, %v248_v32  ;;  %v602_v36 = vadd.s32 4294967169, %v334_v18 }
  0x5d   :  { %v246_v34 = vsel %vm236_vm7, %v243_v26, %v245_v31  ;;  %v898_v38 = vshrl.u32 %v138_v30, 30  ;;  %v250_v39 = vsel %vm236_vm7, %v247_v28, %v249_v35  ;;  %v258_v47 = vmul.u32 %v848_v19, %v242_v33 }
  0x5e   :  { %v902_v40 = vmul.u32.u64.low %v848_v19, %v246_v34  ;;  %v903_v41 = vmul.u32.u64.high %v848_v19, %v246_v34, %v902_v40  ;;  %v907_v43 = vmul.u32.u64.low %v848_v19, %v250_v39  ;;  %v908_v44 = vmul.u32.u64.high %v848_v19, %v250_v39, %v907_v43 }
  0x5f   :  { %v340_v45 = vadd.s32 1, %v602_v36  ;;  %v140_v46 = vshll.u32 %v898_v38, 30  ;;  %v330_v51 = vand.u32 2147483647, %v841_v7  ;;  %v455_v59 = vstv %s896_s29 }
  0x60   :  { %v261_v42 = vadd.s32 1, %v903_v41  ;;  %vm260_vm12 = vc.u32 %v908_v44, %v902_v40  ;;  %v133_v60 = vadd.s32 %v869_v55, %v866_v53  ;;  %v163_v61 = vsub.s32 4, %v898_v38 }
  0x61   :  { %vm341_vm11 = vcmp.gt.s32.totalorder %v340_v45, 0  ;;  %v141_v49 = vsub.s32 %v137_v20, %v140_v46  ;;  %v337_v0 = vand.u32 8388607, %v330_v51  ;;  %v928_v5 = vadd.f32 %v455_v59, %v837_v63 }
  0x62   :  { %v342_v50 = vsel %vm341_vm11, %v340_v45, 0  ;;  %v262_v56 = vsel %vm260_vm12, %v261_v42, %v903_v41  ;;  %v164_v43 = vsel %vm79_vm13, %v163_v61, %v898_v38  ;;  %vm205_vm5 = vcmp.lt.s32.totalorder %v829_v48, 0 }
  0x63   :  { %v143_v52 = vsub.s32 0, %v141_v49  ;;  %v344_v57 = vand.u32 31, %v342_v50  ;;  %v263_v58 = vadd.s32 %v262_v56, %v258_v47  ;;  %v924_v3 = vshrl.u32 %v342_v50, 5 }
  0x64   :  { %v338_v22 = vor.u32 8388608, %v337_v0  ;;  %vm1016_vm8 = vcmp.le.f32.partialorder %v203_v54, 0.7853982  ;;  %vm169_vm9 = vweird.f32 %v816_v29 }
  0x65   :  { %v585_v19 = vmin.u32 %v143_v52, %v141_v49  ;;  %v264_v62 = vadd.s32 536870912, %v263_v58  ;;  %v345_v1 = vsub.s32 32, %v344_v57  ;;  %v347_v4 = vshll.u32 %v738_v9, %v344_v57 }
  0x66   :  { %v350_v55 = vshll.u32 %v739_v11, %v344_v57  ;;  %v353_v12 = vshll.u32 %v740_v13, %v344_v57  ;;  %v356_v14 = vshll.u32 %v741_v15, %v344_v57  ;;  %v359_v20 = vshll.u32 %v742_v17, %v344_v57 }
  0x67   :  { %v145_v2 = vclz %v585_v19  ;;  %v930_v6 = vshrl.u32 %v264_v62, 30  ;;  %v348_v53 = vshrl.u32 %v739_v11, %v345_v1  ;;  %v351_v8 = vshrl.u32 %v740_v13, %v345_v1 }
  0x68   :  { %v357_v16 = vshrl.u32 %v742_v17, %v345_v1  ;;  %v354_v63 = vshrl.u32 %v741_v15, %v345_v1  ;;  %v360_v21 = vshrl.u32 %v743_v25, %v345_v1  ;;  %v346_v23 = vshrl.u32 %v738_v9, %v345_v1 }
  0x69   :  { %v586_v10 = vadd.s32 4294967294, %v145_v2  ;;  %v266_v18 = vshll.u32 %v930_v6, 30  ;;  %vm362_vm15 = vcmp.lt.s32.totalorder %v924_v3, 1  ;;  %v349_v28 = vor.u32 %v348_v53, %v347_v4 }
  0x6a   :  { %v352_v30 = vor.u32 %v351_v8, %v350_v55  ;;  %v358_v34 = vor.u32 %v357_v16, %v356_v14  ;;  %v355_v36 = vor.u32 %v354_v63, %v353_v12  ;;  %v361_v39 = vor.u32 %v360_v21, %v359_v20 }
  0x6b   :  { %vm587_vm14 = vcmp.lt.s32.totalorder %v586_v10, 0  ;;  %v950_v27 = vsub.s32 %v263_v58, %v266_v18  ;;  %vm365_vm1 = vcmp.lt.s32.totalorder %v924_v3, 4  ;;  %vm364_vm2 = vcmp.lt.s32.totalorder %v924_v3, 3 }
  0x6c   :  { %v148_v26 = vsel %vm587_vm14, 0, %v586_v10  ;;  %vm363_vm3 = vcmp.lt.s32.totalorder %v924_v3, 2  ;;  %v366_v46 = vsel %vm362_vm15, %v346_v23, %v349_v28  ;;  %v367_v47 = vsel %vm365_vm1, %v355_v36, 2102212464 }
  0x6d   :  { %v149_v31 = vsub.s32 32, %v148_v26  ;;  %v150_v32 = vshll.u32 %v141_v49, %v148_v26  ;;  %v153_v33 = vsub.s32 4294967266, %v148_v26  ;;  %v269_v35 = vsub.s32 0, %v950_v27 }
  0x6e   :  { %v370_v50 = vsel %vm362_vm15, %v349_v28, %v352_v30  ;;  %v371_v38 = vsel %vm365_vm1, %v358_v34, 920167782  ;;  %v374_v57 = vsel %vm362_vm15, %v352_v30, %v355_v36  ;;  %v375_v58 = vsel %vm365_vm1, %v361_v39, 1326507024 }
  0x6f   :  { %v151_v41 = vshrl.u32 %v133_v60, %v149_v31  ;;  %v154_v37 = vadd.s32 127, %v153_v33  ;;  %v594_v45 = vmin.u32 %v269_v35, %v950_v27  ;;  %v372_v56 = vsel %vm364_vm2, %v355_v36, %v371_v38 }
  0x70   :  { %v368_v19 = vsel %vm364_vm2, %v352_v30, %v367_v47  ;;  %v376_v61 = vsel %vm364_vm2, %v358_v34, %v375_v58  ;;  %v373_v0 = vsel %vm363_vm3, %v370_v50, %v372_v56  ;;  %v378_v2 = vshll.u32 %v338_v22, 8 }
  0x71   :  { %v152_v49 = vor.u32 %v151_v41, %v150_v32  ;;  %v155_v42 = vshll.u32 %v154_v37, 23  ;;  %v271_v52 = vclz %v594_v45  ;;  %v377_v1 = vsel %vm363_vm3, %v374_v57, %v376_v61 }
  0x72   :  { %v166_v53 = vsel %vm946_vm0, 0, %v164_v43  ;;  %v259_v55 = vadd.s32 %v902_v40, %v908_v44  ;;  %v460_v8 = vand.u32 2139095040, %v928_v5  ;;  %v369_v10 = vsel %vm363_vm3, %v366_v46, %v368_v19 }
  0x73   :  { %v156_v59 = vor.u32 4788187, %v155_v42  ;;  %v159_v60 = vcvt.s32.f32 %v152_v49  ;;  %v595_v62 = vadd.s32 4294967294, %v271_v52  ;;  %v289_v40 = vsub.s32 4, %v930_v6 }
  0x74   :  { %v989_v12 = vmul.u32.u64.low %v378_v2, %v377_v1  ;;  %v990_v14 = vmul.u32.u64.high %v378_v2, %v377_v1, %v989_v12  ;;  %v992_v63 = vmul.u32.u64.low %v378_v2, %v373_v0  ;;  %v993_v20 = vmul.u32.u64.high %v378_v2, %v373_v0, %v992_v63 }
  0x75   :  { %v157_v4 = vand.u32 2147483647, %v156_v59  ;;  %vm596_vm4 = vcmp.lt.s32.totalorder %v595_v62, 0  ;;  %v461_v3 = vshrl.u32 %v460_v8, 23  ;;  %v385_v30 = vmul.u32 %v378_v2, %v369_v10 }
  0x76   :  { %v274_v18 = vsel %vm596_vm4, 0, %v595_v62  ;;  %vm387_vm6 = vc.u32 %v990_v14, %v992_v63  ;;  %v1003_v32 = vand.u32 3, %v166_v53  ;;  %v290_v39 = vsel %vm205_vm5, %v289_v40, %v930_v6 }
  0x77   :  { %v160_v16 = vmul.f32 %v159_v60, %v157_v4  ;;  %v275_v21 = vsub.s32 32, %v274_v18  ;;  %v276_v22 = vshll.u32 %v950_v27, %v274_v18  ;;  %v279_v23 = vsub.s32 4294967266, %v274_v18 }
  0x78   :  { %v388_v27 = vadd.s32 1, %v993_v20  ;;  %v611_v33 = vadd.s32 4294967169, %v461_v3  ;;  %v457_v37 = vand.u32 2147483647, %v928_v5  ;;  %v292_v50 = vsel %vm1016_vm8, 0, %v290_v39 }
  0x79   :  { %v161_v44 = vxor.u32 2147483648, %v160_v16  ;;  %v277_v26 = vshrl.u32 %v259_v55, %v275_v21  ;;  %v280_v28 = vadd.s32 127, %v279_v23  ;;  %vm171_vm10 = vcmp.lt.s32.totalorder %v1003_v32, 2 }
  0x7a   :  { %v389_v41 = vsel %vm387_vm6, %v388_v27, %v993_v20  ;;  %v467_v43 = vadd.s32 1, %v611_v33  ;;  %v464_v54 = vand.u32 8388607, %v457_v37  ;;  %vm172_vm11 = vcmp.eq.s32.totalorder %v1003_v32, 0 }
  0x7b   :  { %v162_v31 = vsel %vm79_vm13, %v161_v44, %v160_v16  ;;  %v278_v35 = vor.u32 %v277_v26, %v276_v22  ;;  %v281_v36 = vshll.u32 %v280_v28, 23  ;;  %v390_v47 = vadd.s32 %v389_v41, %v385_v30 }
  0x7c   :  { %v165_v34 = vsel %vm946_vm0, %v816_v29, %v162_v31  ;;  %vm468_vm7 = vcmp.gt.s32.totalorder %v467_v43, 0  ;;  %vm175_vm12 = vcmp.eq.s32.totalorder %v1003_v32, 2  ;;  %v1032_v19 = vand.u32 3, %v292_v50 }
  0x7d   :  { %643 = vcosq.f32 %v165_v34  ;;  %v282_v45 = vor.u32 4788187, %v281_v36  ;;  %v285_v46 = vcvt.s32.f32 %v278_v35  ;;  %v391_v42 = vadd.s32 536870912, %v390_v47 }
  0x7e   :  { %645 = vsinq.f32 %v165_v34  ;;  %v469_v6 = vsel %vm468_vm7, %v467_v43, 0  ;;  %v465_v55 = vor.u32 8388608, %v464_v54  ;;  %vm301_vm2 = vcmp.eq.s32.totalorder %v1032_v19, 2 }
  0x7f   :  { %v283_v49 = vand.u32 2147483647, %v282_v45  ;;  %v471_v38 = vand.u32 31, %v469_v6  ;;  %v1024_v56 = vshrl.u32 %v391_v42, 30  ;;  %v470_v22 = vshrl.u32 %v469_v6, 5 }
  0x80   :  { %v1055_v28 = vshll.u32 %v465_v55, 8  ;;  %vm298_vm3 = vcmp.eq.s32.totalorder %v1032_v19, 0  ;;  %vm297_vm4 = vcmp.lt.s32.totalorder %v1032_v19, 2  ;;  %vm332_vm7 = vcmp.lt.s32.totalorder %v841_v7, 0 }
  0x81   :  { %v286_v52 = vmul.f32 %v285_v46, %v283_v49  ;;  %v472_v57 = vsub.s32 32, %v471_v38  ;;  %v474_v58 = vshll.u32 %v738_v9, %v471_v38  ;;  %v477_v59 = vshll.u32 %v739_v11, %v471_v38 }
  0x82   :  { %v393_v61 = vshll.u32 %v1024_v56, 30  ;;  %v480_v1 = vshll.u32 %v740_v13, %v471_v38  ;;  %v483_v8 = vshll.u32 %v741_v15, %v471_v38  ;;  %v486_v27 = vshll.u32 %v742_v17, %v471_v38 }
  0x83   :  { %v287_v60 = vxor.u32 2147483648, %v286_v52  ;;  %v475_v62 = vshrl.u32 %v739_v11, %v472_v57  ;;  %v478_v0 = vshrl.u32 %v740_v13, %v472_v57  ;;  %v481_v2 = vshrl.u32 %v741_v15, %v472_v57 }
  0x84   :  { %v1041_v53 = vsub.s32 %v390_v47, %v393_v61  ;;  %v484_v18 = vshrl.u32 %v742_v17, %v472_v57  ;;  %v386_v15 = vadd.s32 %v992_v63, %v990_v14  ;;  %v473_v26 = vshrl.u32 %v738_v9, %v472_v57 }
  0x85   :  { %v288_v4 = vsel %vm205_vm5, %v287_v60, %v286_v52  ;;  %v476_v11 = vor.u32 %v475_v62, %v474_v58  ;;  %v479_v16 = vor.u32 %v478_v0, %v477_v59  ;;  %v482_v40 = vor.u32 %v481_v2, %v480_v1 }
  0x86   :  { %v291_v12 = vsel %vm1016_vm8, %v829_v48, %v288_v4  ;;  %v396_v21 = vsub.s32 0, %v1041_v53  ;;  %v485_v31 = vor.u32 %v484_v18, %v483_v8  ;;  %v487_v33 = vshrl.u32 %v743_v25, %v472_v57 }
  0x87   :  { %v644_v10 = vpop.eup %643  ;;  %647 = vcosq.f32 %v291_v12  ;;  %vm489_vm13 = vcmp.lt.s32.totalorder %v470_v22, 1  ;;  %vm490_vm14 = vcmp.lt.s32.totalorder %v470_v22, 2  ;;  %vm491_vm15 = vcmp.lt.s32.totalorder %v470_v22, 3 }
  0x88   :  { %v646_v13 = vpop.eup %645  ;;  %v176_v20 = vxor.u32 2147483648, %v644_v10  ;;  %649 = vsinq.f32 %v291_v12  ;;  %v603_v3 = vmin.u32 %v396_v21, %v1041_v53  ;;  %v488_v9 = vor.u32 %v487_v33, %v486_v27 }
  0x89   :  { %v173_v23 = vxor.u32 2147483648, %v646_v13  ;;  %vm492_vm0 = vcmp.lt.s32.totalorder %v470_v22, 4  ;;  %v493_v36 = vsel %vm489_vm13, %v473_v26, %v476_v11  ;;  %v497_v41 = vsel %vm489_vm13, %v476_v11, %v479_v16 }
  0x8a   :  { %v177_v44 = vsel %vm175_vm12, %v176_v20, %v646_v13  ;;  %v398_v63 = vclz %v603_v3  ;;  %v494_v39 = vsel %vm492_vm0, %v482_v40, 2102212464  ;;  %v498_v43 = vsel %vm492_vm0, %v485_v31, 920167782 }
  0x8b   :  { %v174_v30 = vsel %vm172_vm11, %v644_v10, %v173_v23  ;;  %v495_v17 = vsel %vm491_vm15, %v479_v16, %v494_v39  ;;  %v501_v25 = vsel %vm489_vm13, %v479_v16, %v482_v40  ;;  %v502_v45 = vsel %vm492_vm0, %v488_v9, 1326507024 }
  0x8c   :  { %v178_v14 = vsel %vm171_vm10, %v174_v30, %v177_v44  ;;  %v604_v35 = vadd.s32 4294967294, %v398_v63  ;;  %v496_v32 = vsel %vm490_vm14, %v493_v36, %v495_v17  ;;  %v499_v46 = vsel %vm491_vm15, %v482_v40, %v498_v43 }
  0x8d   :  { %v179_v34 = vsel %vm169_vm9, nan, %v178_v14  ;;  %v503_v47 = vsel %vm491_vm15, %v485_v31, %v502_v45  ;;  %v500_v29 = vsel %vm490_vm14, %v497_v41, %v499_v46  ;;  %vm295_vm5 = vweird.f32 %v829_v48 }
  0x8e   :  { %180 = vst [vmem:[#allocation9] sm:$0xff] %v179_v34  ;;  %vm605_vm1 = vcmp.lt.s32.totalorder %v604_v35, 0  ;;  %v504_v49 = vsel %vm490_vm14, %v501_v25, %v503_v47  ;;  %v1078_v0 = vmul.u32.u64.low %v1055_v28, %v500_v29  ;;  %v1079_v1 = vmul.u32.u64.high %v1055_v28, %v500_v29, %v1078_v0 }
  0x8f   :  { %v401_v24 = vsel %vm605_vm1, 0, %v604_v35  ;;  %v1072_v57 = vmul.u32.u64.low %v1055_v28, %v504_v49  ;;  %v1073_v58 = vmul.u32.u64.high %v1055_v28, %v504_v49, %v1072_v57  ;;  %v512_v11 = vmul.u32 %v1055_v28, %v496_v32 }
  0x90   :  { %v402_v6 = vsub.s32 32, %v401_v24  ;;  %v403_v50 = vshll.u32 %v1041_v53, %v401_v24  ;;  %v406_v38 = vsub.s32 4294967266, %v401_v24  ;;  %v515_v48 = vadd.s32 1, %v1079_v1 }
  0x91   :  { %v648_v42 = vpop.eup %647  ;;  %v513_v8 = vadd.s32 %v1078_v0, %v1073_v58  ;;  %vm514_vm6 = vc.u32 %v1073_v58, %v1078_v0  ;;  %vm331_vm8 = vcmp.le.f32.partialorder %v330_v51, 0.7853982  ;;  %v416_v22 = vsub.s32 4, %v1024_v56 }
  0x92   :  { %v650_v52 = vpop.eup %649  ;;  %v302_v54 = vxor.u32 2147483648, %v648_v42  ;;  %v404_v60 = vshrl.u32 %v386_v15, %v402_v6  ;;  %v407_v61 = vadd.s32 127, %v406_v38  ;;  %v516_v18 = vsel %vm514_vm6, %v515_v48, %v1079_v1 }
  0x93   :  { %v299_v59 = vxor.u32 2147483648, %v650_v52  ;;  %v517_v20 = vadd.s32 %v516_v18, %v512_v11  ;;  %v417_v3 = vsel %vm332_vm7, %v416_v22, %v1024_v56  ;;  %vm422_vm13 = vweird.f32 %v841_v7 }
  0x94   :  { %v303_v62 = vsel %vm301_vm2, %v302_v54, %v650_v52  ;;  %v405_v4 = vor.u32 %v404_v60, %v403_v50  ;;  %v408_v53 = vshll.u32 %v407_v61, 23  ;;  %v419_v30 = vsel %vm331_vm8, 0, %v417_v3 }
  0x95   :  { %v300_v2 = vsel %vm298_vm3, %v648_v42, %v299_v59  ;;  %v518_v23 = vadd.s32 536870912, %v517_v20  ;;  %v423_v27 = vand.u32 3, %v419_v30  ;;  %vm459_vm14 = vcmp.lt.s32.totalorder %v928_v5, 0 }
  0x96   :  { %v304_v55 = vsel %vm297_vm4, %v300_v2, %v303_v62  ;;  %v409_v19 = vor.u32 4788187, %v408_v53  ;;  %v412_v12 = vcvt.s32.f32 %v405_v4  ;;  %vm458_vm15 = vcmp.le.f32.partialorder %v457_v37, 0.7853982 }
  0x97   :  { %v305_v10 = vsel %vm295_vm5, nan, %v304_v55  ;;  %v519_v40 = vshrl.u32 %v518_v23, 30  ;;  %vm428_vm9 = vcmp.eq.s32.totalorder %v423_v27, 2  ;;  %vm425_vm10 = vcmp.eq.s32.totalorder %v423_v27, 0 }
  0x98   :  { %307 = vst [vmem:[#allocation9 + $0x8] sm:$0xff] %v305_v10  ;;  %v410_v16 = vand.u32 2147483647, %v409_v19  ;;  %vm424_vm11 = vcmp.lt.s32.totalorder %v423_v27, 2  ;;  %vm549_vm3 = vweird.f32 %v928_v5 }
  0x99   :  { %v520_v26 = vshll.u32 %v519_v40, 30  ;;  %v543_v50 = vsub.s32 4, %v519_v40 }
  0x9a   :  { %v413_v13 = vmul.f32 %v412_v12, %v410_v16 }
  0x9b   :  { %v521_v28 = vsub.s32 %v517_v20, %v520_v26  ;;  %v544_v54 = vsel %vm459_vm14, %v543_v50, %v519_v40 }
  0x9c   :  { %v414_v21 = vxor.u32 2147483648, %v413_v13  ;;  %v546_v57 = vsel %vm458_vm15, 0, %v544_v54 }
  0x9d   :  { %v523_v31 = vsub.s32 0, %v521_v28  ;;  %v550_v58 = vand.u32 3, %v546_v57 }
  0x9e   :  { %v415_v15 = vsel %vm332_vm7, %v414_v21, %v413_v13 }
  0x9f   :  { %v418_v44 = vsel %vm331_vm8, %v841_v7, %v415_v15  ;;  %v612_v33 = vmin.u32 %v523_v31, %v521_v28  ;;  %vm555_vm0 = vcmp.eq.s32.totalorder %v550_v58, 2  ;;  %vm552_vm1 = vcmp.eq.s32.totalorder %v550_v58, 0 }
  0xa0   :  { %651 = vcosq.f32 %v418_v44  ;;  %vm551_vm2 = vcmp.lt.s32.totalorder %v550_v58, 2 }
  0xa1   :  { %653 = vsinq.f32 %v418_v44  ;;  %v525_v14 = vclz %v612_v33 }
  0xa3   :  { %v613_v63 = vadd.s32 4294967294, %v525_v14 }
  0xa5   :  { %vm614_vm12 = vcmp.lt.s32.totalorder %v613_v63, 0 }
  0xa6   :  { %v528_v36 = vsel %vm614_vm12, 0, %v613_v63 }
  0xa7   :  { %v529_v41 = vsub.s32 32, %v528_v36  ;;  %v530_v17 = vshll.u32 %v521_v28, %v528_v36  ;;  %v533_v43 = vsub.s32 4294967266, %v528_v36 }
  0xa9   :  { %v531_v32 = vshrl.u32 %v513_v8, %v529_v41  ;;  %v534_v46 = vadd.s32 127, %v533_v43 }
  0xaa   :  { %v652_v51 = vpop.eup %651 }
  0xab   :  { %v654_v34 = vpop.eup %653  ;;  %v429_v9 = vxor.u32 2147483648, %v652_v51  ;;  %v532_v47 = vor.u32 %v531_v32, %v530_v17  ;;  %v535_v24 = vshll.u32 %v534_v46, 23 }
  0xac   :  { %v426_v35 = vxor.u32 2147483648, %v654_v34 }
  0xad   :  { %v430_v56 = vsel %vm428_vm9, %v429_v9, %v654_v34  ;;  %v536_v29 = vor.u32 4788187, %v535_v24  ;;  %v539_v49 = vcvt.s32.f32 %v532_v47 }
  0xae   :  { %v427_v39 = vsel %vm425_vm10, %v652_v51, %v426_v35 }
  0xaf   :  { %v431_v25 = vsel %vm424_vm11, %v427_v39, %v430_v56  ;;  %v537_v42 = vand.u32 2147483647, %v536_v29 }
  0xb0   :  { %v432_v45 = vsel %vm422_vm13, nan, %v431_v25 }
  0xb1   :  { %434 = vst [vmem:[#allocation9 + $0x10] sm:$0xff] %v432_v45  ;;  %v540_v6 = vmul.f32 %v539_v49, %v537_v42 }
  0xb3   :  { %v541_v7 = vxor.u32 2147483648, %v540_v6 }
  0xb5   :  { %v542_v38 = vsel %vm459_vm14, %v541_v7, %v540_v6 }
  0xb6   :  { %v545_v52 = vsel %vm458_vm15, %v928_v5, %v542_v38 }
  0xb7   :  { %655 = vcosq.f32 %v545_v52 }
  0xb8   :  { %657 = vsinq.f32 %v545_v52 }
  0xc1   :  { %v656_v59 = vpop.eup %655 }
  0xc2   :  { %v658_v60 = vpop.eup %657  ;;  %v556_v61 = vxor.u32 2147483648, %v656_v59 }
  0xc3   :  { %v553_v62 = vxor.u32 2147483648, %v658_v60 }
  0xc4   :  { %v557_v37 = vsel %vm555_vm0, %v556_v61, %v658_v60 }
  0xc5   :  { %v554_v0 = vsel %vm552_vm1, %v656_v59, %v553_v62 }
  0xc6   :  { %v558_v1 = vsel %vm551_vm2, %v554_v0, %v557_v37 }
  0xc7   :  { %v559_v2 = vsel %vm549_vm3, nan, %v558_v1 }
  0xc8   :  { %561 = vst [vmem:[#allocation9 + $0x18] sm:$0xff] %v559_v2 }
  0xc9   :  { %714 = shalt.err (!%p711_p6)
}
  0xca   :  { %s715_s7 = scalar_lea.hbm %s1116_s3, 512 }
  0xcb   :  { %p716_p7 = scmp.ne.s32.totalorder %s1116_s3, %s715_s7  ;;  %p719_p8 = scmp.lt.u32.totalorder %s715_s7, %s1116_s3 }
  0xcd   :  { %p721_p9 = pnand %p719_p8, %p716_p7 }
  0xcf   :  { %724 = shalt.err (!%p721_p9)
}
  0xd0   :  { %573 = dma.vmem_to_hbm [thread:$0]  %s568_s4, 512, %s1116_s3, [#allocation4], %s736_s8, %s736_s8, %s737_s9  }
  0xd1   :  { %731 = dma.done.wait [#allocation4], 512  }
  0xd2   :  { %732 = vsyncadd [#allocation4], 4294966784 }
  0xd3   :  { %577 = vsyncpa [#allocation3], 1 }
  0xd4   :  { %578 = vsyncpa [#allocation4], 1 }
  0xd5   :  { %579 = vsyncpa [#allocation5], 1 }
  0xd6   :  { %580 = vsyncpa [#allocation6], 1 }

</bundles_post_ra>
